<compile_context>
chip_gen: v5e
topology: v5e:2x2
jax: 0.10.0
libtpu: 0.0.40
codegen_flags: <defaults>
</compile_context>

<pallas_src>
import jax
import jax.numpy as jnp
from jax.experimental import pallas as pl
from jax.experimental.pallas import tpu as pltpu

IN_DIM = 600
HID_DIM = 64
OUT_DIM = 600
H_PAD = 128   # hidden 64 -> 128 (lane-dense); padded weight/bias entries are zero


def mlp_kernel(x_ref, w1_ref, b1_ref, w2_ref, b2_ref, w3_ref, b3_ref,
               w4_ref, b4_ref, o_ref):
    # bf16 MXU operands (single-pass), f32 accumulation, f32 bias add / ReLU.
    x = x_ref[...].astype(jnp.bfloat16)
    h = jnp.dot(x, w1_ref[...], preferred_element_type=jnp.float32)
    h = jnp.maximum(h + b1_ref[...], 0.0)
    h = jnp.dot(h.astype(jnp.bfloat16), w2_ref[...], preferred_element_type=jnp.float32)
    h = jnp.maximum(h + b2_ref[...], 0.0)
    h = jnp.dot(h.astype(jnp.bfloat16), w3_ref[...], preferred_element_type=jnp.float32)
    h = jnp.maximum(h + b3_ref[...], 0.0)
    h = jnp.dot(h.astype(jnp.bfloat16), w4_ref[...], preferred_element_type=jnp.float32)
    o_ref[...] = (h + b4_ref[...]).astype(o_ref.dtype)


def _pad2d(a, rows, cols, dtype):
    return jnp.pad(a.astype(dtype), ((0, rows - a.shape[0]), (0, cols - a.shape[1])))


def pack_params(params):
    """One-time packing: pad hidden dim 64 -> 128 with zeros, weights -> bf16, biases f32.
    Weights are (in_features, out_features); biases (1, out_features)."""
    return dict(
        w1=_pad2d(params["w1"], IN_DIM, H_PAD, jnp.bfloat16),
        b1=_pad2d(params["b1"], 1, H_PAD, jnp.float32),
        w2=_pad2d(params["w2"], H_PAD, H_PAD, jnp.bfloat16),
        b2=_pad2d(params["b2"], 1, H_PAD, jnp.float32),
        w3=_pad2d(params["w3"], H_PAD, H_PAD, jnp.bfloat16),
        b3=_pad2d(params["b3"], 1, H_PAD, jnp.float32),
        w4=_pad2d(params["w4"], H_PAD, OUT_DIM, jnp.bfloat16),
        b4=_pad2d(params["b4"], 1, OUT_DIM, jnp.float32),
    )


def net_forward(x, packed, tile_b=512):
    """x: (B, 600) float32. packed: output of pack_params()."""
    B = x.shape[0]
    x = x.astype(jnp.float32)

    # Keep the tile a multiple of 8 (sublanes) and never larger than the rounded batch.
    tile_b = min(tile_b, ((B + 7) // 8) * 8)
    grid = (pl.cdiv(B, tile_b),)   # ragged final block handled by clipped block DMA

    w1, b1 = packed["w1"], packed["b1"]
    w2, b2 = packed["w2"], packed["b2"]
    w3, b3 = packed["w3"], packed["b3"]
    w4, b4 = packed["w4"], packed["b4"]

    def const_spec(arr):
        # Same block every grid step -> DMA'd once, stays resident in VMEM.
        return pl.BlockSpec(arr.shape, lambda i: (0, 0))

    flops = 2 * B * (IN_DIM * HID_DIM + 2 * HID_DIM * HID_DIM + HID_DIM * OUT_DIM)
    param_bytes = sum(int(v.size) * v.dtype.itemsize for v in packed.values())
    cost = pl.CostEstimate(
        flops=flops,
        transcendentals=0,
        bytes_accessed=B * (IN_DIM + OUT_DIM) * 4 + param_bytes,
    )

    return pl.pallas_call(
        mlp_kernel,
        out_shape=jax.ShapeDtypeStruct((B, OUT_DIM), jnp.float32),
        grid_spec=pltpu.PrefetchScalarGridSpec(
            num_scalar_prefetch=0,
            grid=grid,
            in_specs=[
                pl.BlockSpec((tile_b, IN_DIM), lambda i: (i, 0)),
                const_spec(w1), const_spec(b1),
                const_spec(w2), const_spec(b2),
                const_spec(w3), const_spec(b3),
                const_spec(w4), const_spec(b4),
            ],
            out_specs=pl.BlockSpec((tile_b, OUT_DIM), lambda i: (i, 0)),
        ),
        compiler_params=pltpu.CompilerParams(
            # Batch tiles are independent -> shard across TensorCores on v7x.
            dimension_semantics=("parallel",),
        ),
        cost_estimate=cost,
    )(x, w1, b1, w2, b2, w3, b3, w4, b4)


def init_params(key):
    """Deterministic init mimicking PyTorch Linear's U(-1/sqrt(fan_in), +1/sqrt(fan_in)).
    Weights stored as (in_features, out_features); biases as (1, out_features)."""
    dims = [(IN_DIM, HID_DIM), (HID_DIM, HID_DIM), (HID_DIM, HID_DIM), (HID_DIM, OUT_DIM)]
    params = {}
    keys = jax.random.split(key, 2 * len(dims))
    for idx, (fan_in, fan_out) in enumerate(dims):
        bound = 1.0 / (fan_in ** 0.5)
        kw, kb = keys[2 * idx], keys[2 * idx + 1]
        params[f"w{idx + 1}"] = jax.random.uniform(
            kw, (fan_in, fan_out), jnp.float32, minval=-bound, maxval=bound)
        params[f"b{idx + 1}"] = jax.random.uniform(
            kb, (1, fan_out), jnp.float32, minval=-bound, maxval=bound)
    return params


def net_forward_ref(x, params):
    h = jnp.maximum(x @ params["w1"] + params["b1"], 0.0)
    h = jnp.maximum(h @ params["w2"] + params["b2"], 0.0)
    h = jnp.maximum(h @ params["w3"] + params["b3"], 0.0)
    return h @ params["w4"] + params["b4"]


if __name__ == "__main__":
    key = jax.random.PRNGKey(0)
    kx, kp = jax.random.split(key)
    B = 8
    x = jax.random.normal(kx, (B, IN_DIM), jnp.float32)
    params = init_params(kp)
    packed = pack_params(params)

    out = jax.block_until_ready(net_forward(x, packed))
    ref = net_forward_ref(x, params)
    assert out.shape == (B, OUT_DIM)
    # bf16 MXU operands with f32 accumulation -> relaxed tolerance vs. the f32 reference.
    assert jnp.allclose(out, ref, atol=5e-2, rtol=5e-2), float(jnp.max(jnp.abs(out - ref)))

    # Batch that is not a multiple of 8 / the tile: exercises the ragged final block.
    B2 = 37
    x2 = jax.random.normal(jax.random.PRNGKey(1), (B2, IN_DIM), jnp.float32)
    out2 = jax.block_until_ready(net_forward(x2, packed))
    ref2 = net_forward_ref(x2, params)
    assert out2.shape == (B2, OUT_DIM)
    assert jnp.allclose(out2, ref2, atol=5e-2, rtol=5e-2)

    print("KERNEL_OK")
</pallas_src>

<mosaic_0001>
module attributes {stable_mosaic.version = 11 : i64} {
  func.func @mlp_kernel(%arg0: i32, %arg1: memref<8x600xf32, #tpu.memory_space<vmem>>, %arg2: memref<600x128xbf16, #tpu.memory_space<vmem>>, %arg3: memref<1x128xf32, #tpu.memory_space<vmem>>, %arg4: memref<128x128xbf16, #tpu.memory_space<vmem>>, %arg5: memref<1x128xf32, #tpu.memory_space<vmem>>, %arg6: memref<128x128xbf16, #tpu.memory_space<vmem>>, %arg7: memref<1x128xf32, #tpu.memory_space<vmem>>, %arg8: memref<128x600xbf16, #tpu.memory_space<vmem>>, %arg9: memref<1x600xf32, #tpu.memory_space<vmem>>, %arg10: memref<8x600xf32, #tpu.memory_space<vmem>>) attributes {dimension_semantics = [#tpu.dimension_semantics<parallel>], iteration_bounds = array<i64: 1>, scalar_prefetch = 0 : i64, scratch_operands = 0 : i64, tpu.core_type = #tpu.core_type<tc>, window_params = [{transform_indices = @transform_0, window_bounds = array<i64: 8, 600>}, {pipeline_mode = #tpu.pipeline_mode<synchronous>, transform_indices = @transform_1, window_bounds = array<i64: 600, 128>}, {pipeline_mode = #tpu.pipeline_mode<synchronous>, transform_indices = @transform_2, window_bounds = array<i64: 1, 128>}, {pipeline_mode = #tpu.pipeline_mode<synchronous>, transform_indices = @transform_3, window_bounds = array<i64: 128, 128>}, {pipeline_mode = #tpu.pipeline_mode<synchronous>, transform_indices = @transform_4, window_bounds = array<i64: 1, 128>}, {pipeline_mode = #tpu.pipeline_mode<synchronous>, transform_indices = @transform_5, window_bounds = array<i64: 128, 128>}, {pipeline_mode = #tpu.pipeline_mode<synchronous>, transform_indices = @transform_6, window_bounds = array<i64: 1, 128>}, {pipeline_mode = #tpu.pipeline_mode<synchronous>, transform_indices = @transform_7, window_bounds = array<i64: 128, 600>}, {pipeline_mode = #tpu.pipeline_mode<synchronous>, transform_indices = @transform_8, window_bounds = array<i64: 1, 600>}, {transform_indices = @transform_9, window_bounds = array<i64: 8, 600>}]} {
    %c0 = arith.constant 0 : index
    %c0_0 = arith.constant 0 : index
    %0 = vector.load %arg1[%c0, %c0_0] : memref<8x600xf32, #tpu.memory_space<vmem>>, vector<8x600xf32>
    %1 = arith.truncf %0 : vector<8x600xf32> to vector<8x600xbf16>
    %c0_1 = arith.constant 0 : index
    %c0_2 = arith.constant 0 : index
    %2 = vector.load %arg2[%c0_1, %c0_2] : memref<600x128xbf16, #tpu.memory_space<vmem>>, vector<600x128xbf16>
    %cst = arith.constant dense<0.000000e+00> : vector<8x128xf32>
    %3 = tpu.matmul %1, %2, %cst {dimension_numbers = #tpu.dot_dimension_numbers<[1], [0], [0], [1], [0, 0, 1, 1], [], []>} : vector<8x600xbf16>, vector<600x128xbf16>, vector<8x128xf32> -> vector<8x128xf32>
    %c0_3 = arith.constant 0 : index
    %c0_4 = arith.constant 0 : index
    %4 = vector.load %arg3[%c0_3, %c0_4] : memref<1x128xf32, #tpu.memory_space<vmem>>, vector<1x128xf32>
    %5 = vector.broadcast %4 : vector<1x128xf32> to vector<8x128xf32>
    %6 = arith.addf %3, %5 : vector<8x128xf32>
    %cst_5 = arith.constant 0.000000e+00 : f32
    %7 = vector.broadcast %cst_5 : f32 to vector<8x128xf32>
    %8 = arith.maximumf %6, %7 : vector<8x128xf32>
    %9 = arith.truncf %8 : vector<8x128xf32> to vector<8x128xbf16>
    %c0_6 = arith.constant 0 : index
    %c0_7 = arith.constant 0 : index
    %10 = vector.load %arg4[%c0_6, %c0_7] : memref<128x128xbf16, #tpu.memory_space<vmem>>, vector<128x128xbf16>
    %cst_8 = arith.constant dense<0.000000e+00> : vector<8x128xf32>
    %11 = tpu.matmul %9, %10, %cst_8 {dimension_numbers = #tpu.dot_dimension_numbers<[1], [0], [0], [1], [0, 0, 1, 1], [], []>} : vector<8x128xbf16>, vector<128x128xbf16>, vector<8x128xf32> -> vector<8x128xf32>
    %c0_9 = arith.constant 0 : index
    %c0_10 = arith.constant 0 : index
    %12 = vector.load %arg5[%c0_9, %c0_10] : memref<1x128xf32, #tpu.memory_space<vmem>>, vector<1x128xf32>
    %13 = vector.broadcast %12 : vector<1x128xf32> to vector<8x128xf32>
    %14 = arith.addf %11, %13 : vector<8x128xf32>
    %cst_11 = arith.constant 0.000000e+00 : f32
    %15 = vector.broadcast %cst_11 : f32 to vector<8x128xf32>
    %16 = arith.maximumf %14, %15 : vector<8x128xf32>
    %17 = arith.truncf %16 : vector<8x128xf32> to vector<8x128xbf16>
    %c0_12 = arith.constant 0 : index
    %c0_13 = arith.constant 0 : index
    %18 = vector.load %arg6[%c0_12, %c0_13] : memref<128x128xbf16, #tpu.memory_space<vmem>>, vector<128x128xbf16>
    %cst_14 = arith.constant dense<0.000000e+00> : vector<8x128xf32>
    %19 = tpu.matmul %17, %18, %cst_14 {dimension_numbers = #tpu.dot_dimension_numbers<[1], [0], [0], [1], [0, 0, 1, 1], [], []>} : vector<8x128xbf16>, vector<128x128xbf16>, vector<8x128xf32> -> vector<8x128xf32>
    %c0_15 = arith.constant 0 : index
    %c0_16 = arith.constant 0 : index
    %20 = vector.load %arg7[%c0_15, %c0_16] : memref<1x128xf32, #tpu.memory_space<vmem>>, vector<1x128xf32>
    %21 = vector.broadcast %20 : vector<1x128xf32> to vector<8x128xf32>
    %22 = arith.addf %19, %21 : vector<8x128xf32>
    %cst_17 = arith.constant 0.000000e+00 : f32
    %23 = vector.broadcast %cst_17 : f32 to vector<8x128xf32>
    %24 = arith.maximumf %22, %23 : vector<8x128xf32>
    %25 = arith.truncf %24 : vector<8x128xf32> to vector<8x128xbf16>
    %c0_18 = arith.constant 0 : index
    %c0_19 = arith.constant 0 : index
    %26 = vector.load %arg8[%c0_18, %c0_19] : memref<128x600xbf16, #tpu.memory_space<vmem>>, vector<128x600xbf16>
    %cst_20 = arith.constant dense<0.000000e+00> : vector<8x600xf32>
    %27 = tpu.matmul %25, %26, %cst_20 {dimension_numbers = #tpu.dot_dimension_numbers<[1], [0], [0], [1], [0, 0, 1, 1], [], []>} : vector<8x128xbf16>, vector<128x600xbf16>, vector<8x600xf32> -> vector<8x600xf32>
    %c0_21 = arith.constant 0 : index
    %c0_22 = arith.constant 0 : index
    %28 = vector.load %arg9[%c0_21, %c0_22] : memref<1x600xf32, #tpu.memory_space<vmem>>, vector<1x600xf32>
    %29 = vector.broadcast %28 : vector<1x600xf32> to vector<8x600xf32>
    %30 = arith.addf %27, %29 : vector<8x600xf32>
    %c0_23 = arith.constant 0 : index
    %c0_24 = arith.constant 0 : index
    %31 = vector.load %arg10[%c0_23, %c0_24] : memref<8x600xf32, #tpu.memory_space<vmem>>, vector<8x600xf32>
    tpu.vector_store %arg10[%c0_23, %c0_24], %30 {strides = array<i32>} : memref<8x600xf32, #tpu.memory_space<vmem>>, vector<8x600xf32>,
    return
  }
  func.func @transform_0(%arg0: i32) -> (i32, i32) {
    %c0_i32 = arith.constant 0 : i32
    %c0_i32_0 = arith.constant 0 : i32
    return %arg0, %c0_i32 : i32, i32
  }
  func.func @transform_1(%arg0: i32) -> (i32, i32) {
    %c0_i32 = arith.constant 0 : i32
    %c0_i32_0 = arith.constant 0 : i32
    %c0_i32_1 = arith.constant 0 : i32
    return %c0_i32, %c0_i32_0 : i32, i32
  }
  func.func @transform_2(%arg0: i32) -> (i32, i32) {
    %c0_i32 = arith.constant 0 : i32
    %c0_i32_0 = arith.constant 0 : i32
    %c0_i32_1 = arith.constant 0 : i32
    return %c0_i32, %c0_i32_0 : i32, i32
  }
  func.func @transform_3(%arg0: i32) -> (i32, i32) {
    %c0_i32 = arith.constant 0 : i32
    %c0_i32_0 = arith.constant 0 : i32
    %c0_i32_1 = arith.constant 0 : i32
    return %c0_i32, %c0_i32_0 : i32, i32
  }
  func.func @transform_4(%arg0: i32) -> (i32, i32) {
    %c0_i32 = arith.constant 0 : i32
    %c0_i32_0 = arith.constant 0 : i32
    %c0_i32_1 = arith.constant 0 : i32
    return %c0_i32, %c0_i32_0 : i32, i32
  }
  func.func @transform_5(%arg0: i32) -> (i32, i32) {
    %c0_i32 = arith.constant 0 : i32
    %c0_i32_0 = arith.constant 0 : i32
    %c0_i32_1 = arith.constant 0 : i32
    return %c0_i32, %c0_i32_0 : i32, i32
  }
  func.func @transform_6(%arg0: i32) -> (i32, i32) {
    %c0_i32 = arith.constant 0 : i32
    %c0_i32_0 = arith.constant 0 : i32
    %c0_i32_1 = arith.constant 0 : i32
    return %c0_i32, %c0_i32_0 : i32, i32
  }
  func.func @transform_7(%arg0: i32) -> (i32, i32) {
    %c0_i32 = arith.constant 0 : i32
    %c0_i32_0 = arith.constant 0 : i32
    %c0_i32_1 = arith.constant 0 : i32
    return %c0_i32, %c0_i32_0 : i32, i32
  }
  func.func @transform_8(%arg0: i32) -> (i32, i32) {
    %c0_i32 = arith.constant 0 : i32
    %c0_i32_0 = arith.constant 0 : i32
    %c0_i32_1 = arith.constant 0 : i32
    return %c0_i32, %c0_i32_0 : i32, i32
  }
  func.func @transform_9(%arg0: i32) -> (i32, i32) {
    %c0_i32 = arith.constant 0 : i32
    %c0_i32_0 = arith.constant 0 : i32
    return %arg0, %c0_i32 : i32, i32
  }
}

</mosaic_0001>

<bundles_post_ra>
// kernel: tpu_custom_call.1
= control target key start
LH: loop header
LB: loop body
LE: loop exit
PB: predicated region body
PF: predicated region fallthrough
CT: control target
= control target key end

     0   :  { %s1924_s0 = inlined_call_operand.vmem [shape: f32[8,600], index: 0, kind: input, shape index: {}]   ;;  %s1925_s1 = inlined_call_operand.vmem [shape: bf16[600,128], index: 1, kind: input, shape index: {}]   ;;  %s1926_s2 = inlined_call_operand.vmem [shape: f32[1,128], index: 2, kind: input, shape index: {}]   ;;  %s1927_s3 = inlined_call_operand.vmem [shape: bf16[128,128], index: 3, kind: input, shape index: {}]   ;;  %s1928_s4 = inlined_call_operand.vmem [shape: f32[1,128], index: 4, kind: input, shape index: {}]   ;;  %s1929_s5 = inlined_call_operand.vmem [shape: bf16[128,128], index: 5, kind: input, shape index: {}]   ;;  %s1930_s6 = inlined_call_operand.vmem [shape: f32[1,128], index: 6, kind: input, shape index: {}]   ;;  %s1931_s7 = inlined_call_operand.vmem [shape: bf16[128,600], index: 7, kind: input, shape index: {}]   ;;  %s1932_s8 = inlined_call_operand.vmem [shape: f32[1,600], index: 8, kind: input, shape index: {}]   ;;  %s1933_s9 = inlined_call_operand.hbm [shape: f32[8,600], index: 9, kind: output, shape index: {}]  }
   0x1   :  { %v1323_v0 = vld [vmem:[%s1925_s1 + $0x38] sm:$0xff]  ;;  %v1322_v4 = vld [vmem:[%s1925_s1 + $0x30] sm:$0xff]  ;;  %v1321_v8 = vld [vmem:[%s1925_s1 + $0x28] sm:$0xff] }
   0x2   :  { %v1339_v1 = vld [vmem:[%s1925_s1 + $0xb8] sm:$0xff]  ;;  %356 = vmatpush.bf16.msra.mxu0 %v1323_v0  ;;  %v1338_v5 = vld [vmem:[%s1925_s1 + $0xb0] sm:$0xff]  ;;  %v1337_v9 = vld [vmem:[%s1925_s1 + $0xa8] sm:$0xff] }
   0x3   :  { %v1347_v2 = vld [vmem:[%s1925_s1 + $0xf8] sm:$0xff]  ;;  %382 = vmatpush.bf16.msra.mxu2 %v1339_v1  ;;  %v1346_v6 = vld [vmem:[%s1925_s1 + $0xf0] sm:$0xff]  ;;  %v1345_v10 = vld [vmem:[%s1925_s1 + $0xe8] sm:$0xff] }
   0x4   :  { %v1331_v3 = vld [vmem:[%s1925_s1 + $0x78] sm:$0xff]  ;;  %395 = vmatpush.bf16.msra.mxu3 %v1347_v2  ;;  %v1330_v7 = vld [vmem:[%s1925_s1 + $0x70] sm:$0xff]  ;;  %v1329_v11 = vld [vmem:[%s1925_s1 + $0x68] sm:$0xff] }
   0x5   :  { %369 = vmatpush.bf16.msra.mxu1 %v1331_v3  ;;  %v1320_v12 = vld [vmem:[%s1925_s1 + $0x20] sm:$0xff]  ;;  %v1319_v16 = vld [vmem:[%s1925_s1 + $0x18] sm:$0xff] }
   0x6   :  { %357 = vmatpush.bf16.msra.mxu0 %v1322_v4  ;;  %v1336_v13 = vld [vmem:[%s1925_s1 + $0xa0] sm:$0xff]  ;;  %v1335_v17 = vld [vmem:[%s1925_s1 + $0x98] sm:$0xff] }
   0x7   :  { %383 = vmatpush.bf16.msra.mxu2 %v1338_v5  ;;  %v1344_v14 = vld [vmem:[%s1925_s1 + $0xe0] sm:$0xff]  ;;  %v1343_v18 = vld [vmem:[%s1925_s1 + $0xd8] sm:$0xff] }
   0x8   :  { %396 = vmatpush.bf16.msra.mxu3 %v1346_v6  ;;  %v1328_v15 = vld [vmem:[%s1925_s1 + $0x60] sm:$0xff]  ;;  %v1327_v19 = vld [vmem:[%s1925_s1 + $0x58] sm:$0xff] }
   0x9   :  { %370 = vmatpush.bf16.msra.mxu1 %v1330_v7 }
   0xa   :  { %358 = vmatpush.bf16.msra.mxu0 %v1321_v8 }
   0xb   :  { %384 = vmatpush.bf16.msra.mxu2 %v1337_v9 }
   0xc   :  { %397 = vmatpush.bf16.msra.mxu3 %v1345_v10 }
   0xd   :  { %371 = vmatpush.bf16.msra.mxu1 %v1329_v11 }
   0xe   :  { %359 = vmatpush.bf16.msra.mxu0 %v1320_v12 }
   0xf   :  { %385 = vmatpush.bf16.msra.mxu2 %v1336_v13 }
  0x10   :  { %398 = vmatpush.bf16.msra.mxu3 %v1344_v14 }
  0x11   :  { %372 = vmatpush.bf16.msra.mxu1 %v1328_v15 }
  0x12   :  { %14 = vsyncpa [#allocation3], 0  ;;  %v118_v20 = vld [vmem:[%s1925_s1 + $0x128] sm:$0xf]  ;;  %360 = vmatpush.bf16.msra.mxu0 %v1319_v16  ;;  %v1318_v21 = vld [vmem:[%s1925_s1 + $0x10] sm:$0xff]  ;;  %vm352_vm0 = vcmask 1043456  }
  0x13   :  { %386 = vmatpush.bf16.msra.mxu2 %v1335_v17  ;;  %v1334_v22 = vld [vmem:[%s1925_s1 + $0x90] sm:$0xff]  ;;  %v272_v25 = vunpack.c.l.b16 %v118_v20  ;;  %v1317_v26 = vld [vmem:[%s1925_s1 + $0x8] sm:$0xff]  ;;  %v1316_v31 = vld [vmem:[%s1925_s1] sm:$0xff]  ;;  %vm348_vm1 = vcmask 719872   ;;  %s934_s26 = sshll.u32 %s1933_s9, 4  ;;  %s935_s26 = int_to_ptr.hbm [resolvable:$true] %s934_s26 }
  0x14   :  { %399 = vmatpush.bf16.msra.mxu3 %v1343_v18  ;;  %v1342_v23 = vld [vmem:[%s1925_s1 + $0xd0] sm:$0xff]  ;;  %v1333_v27 = vld [vmem:[%s1925_s1 + $0x88] sm:$0xff]  ;;  %v34_v32 = vld [vmem:[%s1924_s0] sm:$0xff] }
  0x15   :  { %373 = vmatpush.bf16.msra.mxu1 %v1327_v19  ;;  %v1326_v24 = vld [vmem:[%s1925_s1 + $0x50] sm:$0xff]  ;;  %v1341_v28 = vld [vmem:[%s1925_s1 + $0xc8] sm:$0xff]  ;;  %v310_v30 = vpack.c.b16 %v272_v25, %v272_v25  ;;  %v1332_v33 = vld [vmem:[%s1925_s1 + $0x80] sm:$0xff]  ;;  %v39_v40 = vpack.c.bf16 %v34_v32, %v34_v32 }
  0x16   :  { %361 = vmatpush.bf16.msra.mxu0 %v1318_v21  ;;  %v1325_v29 = vld [vmem:[%s1925_s1 + $0x48] sm:$0xff]  ;;  %v36_v34 = vld [vmem:[%s1924_s0 + $0x10] sm:$0xff]  ;;  %v1340_v35 = vld [vmem:[%s1925_s1 + $0xc0] sm:$0xff] }
  0x17   :  { %387 = vmatpush.bf16.msra.mxu2 %v1334_v22  ;;  %v37_v36 = vld [vmem:[%s1924_s0 + $0x18] sm:$0xff]  ;;  %v354_v37 = vsel %vm352_vm0, %v310_v30, 0  ;;  %v1324_v38 = vld [vmem:[%s1925_s1 + $0x40] sm:$0xff]  ;;  %v35_v39 = vld [vmem:[%s1924_s0 + $0x8] sm:$0xff]  ;;  %v41_v41 = vpack.c.bf16 %v36_v34, %v36_v34 }
  0x18   :  { %400 = vmatpush.bf16.msra.mxu3 %v1342_v23  ;;  %v42_v42 = vpack.c.bf16 %v37_v36, %v37_v36  ;;  %v1360_v43 = vld [vmem:[%s1927_s3 + $0x38] sm:$0xff]  ;;  %v1352_v44 = vld [vmem:[%s1925_s1 + $0x120] sm:$0xff]  ;;  %v40_v45 = vpack.c.bf16 %v35_v39, %v35_v39  ;;  %v1350_v47 = vld [vmem:[%s1925_s1 + $0x110] sm:$0xff] }
  0x19   :  { %374 = vmatpush.bf16.msra.mxu1 %v1326_v24  ;;  %v1351_v46 = vld [vmem:[%s1925_s1 + $0x118] sm:$0xff]  ;;  %v1349_v48 = vld [vmem:[%s1925_s1 + $0x108] sm:$0xff]  ;;  %v1348_v49 = vld [vmem:[%s1925_s1 + $0x100] sm:$0xff] }
  0x1a   :  { %362 = vmatpush.bf16.msra.mxu0 %v1317_v26  ;;  %v38_v50 = vld [vmem:[%s1924_s0 + $0x20] sm:$0xff]  ;;  %v1359_v52 = vld [vmem:[%s1927_s3 + $0x30] sm:$0xff]  ;;  %v1358_v53 = vld [vmem:[%s1927_s3 + $0x28] sm:$0xff] }
  0x1b   :  { %388 = vmatpush.bf16.msra.mxu2 %v1333_v27  ;;  %v43_v51 = vpack.c.bf16 %v38_v50, %v38_v50  ;;  %v1357_v54 = vld [vmem:[%s1927_s3 + $0x20] sm:$0xff]  ;;  %v1356_v55 = vld [vmem:[%s1927_s3 + $0x18] sm:$0xff]  ;;  %v1355_v56 = vld [vmem:[%s1927_s3 + $0x10] sm:$0xff] }
  0x1c   :  { %401 = vmatpush.bf16.msra.mxu3 %v1341_v28  ;;  %v1354_v57 = vld [vmem:[%s1927_s3 + $0x8] sm:$0xff]  ;;  %v1353_v58 = vld [vmem:[%s1927_s3] sm:$0xff]  ;;  %v1368_v59 = vld [vmem:[%s1929_s5 + $0x38] sm:$0xff] }
  0x1d   :  { %375 = vmatpush.bf16.msra.mxu1 %v1325_v29  ;;  %v1367_v60 = vld [vmem:[%s1929_s5 + $0x30] sm:$0xff]  ;;  %v1366_v63 = vld [vmem:[%s1929_s5 + $0x28] sm:$0xff]  ;;  %v1410_v0 = vld [vmem:[%s1926_s2] ss:$0 sm:$0xff] }
  0x1e   :  { %363 = vmatpush.bf16.msra.mxu0 %v1316_v31  ;;  %v1365_v3 = vld [vmem:[%s1929_s5 + $0x20] sm:$0xff]  ;;  %v1364_v7 = vld [vmem:[%s1929_s5 + $0x18] sm:$0xff]  ;;  %v1363_v11 = vld [vmem:[%s1929_s5 + $0x10] sm:$0xff] }
  0x1f   :  { %389 = vmatpush.bf16.msra.mxu2 %v1332_v33  ;;  %v1362_v19 = vld [vmem:[%s1929_s5 + $0x8] sm:$0xff]  ;;  %v1361_v20 = vld [vmem:[%s1929_s5] sm:$0xff]  ;;  %v1298_v21 = vld [vmem:[%s1931_s7 + $0x118] sm:$0xf] }
  0x20   :  { %402 = vmatpush.bf16.msra.mxu3 %v1340_v35  ;;  %v1406_v22 = vld [vmem:[%s1931_s7 + $0x128] sm:$0xf0]  ;;  %v1278_v23 = vld [vmem:[%s1931_s7 + $0xf0] sm:$0xf]  ;;  %v1401_v25 = vld [vmem:[%s1931_s7 + $0x100] sm:$0xf0] }
  0x21   :  { %376 = vmatpush.bf16.msra.mxu1 %v1324_v38  ;;  %364 = vmatmul.bf16.vlgmr.msra.gmra.mxu0 %v39_v40  ;;  %v1299_v24 = vor.u32 %v1406_v22, %v1298_v21  ;;  %v1258_v26 = vld [vmem:[%s1931_s7 + $0xc8] sm:$0xf]  ;;  %v1404_v27 = vld [vmem:[%s1931_s7 + $0x11c] sm:$0xf]  ;;  %v1279_v28 = vor.u32 %v1401_v25, %v1278_v23  ;;  %v1300_v29 = vld [vmem:[%s1931_s7 + $0x12c] sm:$0xf0] }
  0x22   :  { %410 = vmatpush.bf16.msrb.mxu0 %v354_v37  ;;  %390 = vmatmul.bf16.vlgmr.msra.gmra.mxu2 %v41_v41  ;;  %v1306_v30 = vld [vmem:[%s1931_s7 + $0x120] sm:$0xf]  ;;  %v1407_v31 = vld [vmem:[%s1931_s7 + $0x130] sm:$0xf0]  ;;  %v1396_v32 = vld [vmem:[%s1931_s7 + $0xd8] sm:$0xf0]  ;;  %v1303_v33 = vor.u32 %v1404_v27, %v1300_v29 }
  0x23   :  { %403 = vmatmul.bf16.vlgmr.msra.gmra.mxu3 %v42_v42  ;;  %574 = vmatpush.bf16.msrb.mxu2 %v1368_v59  ;;  %v1307_v34 = vor.u32 %v1407_v31, %v1306_v30  ;;  %v1405_v35 = vld [vmem:[%s1931_s7 + $0x124] sm:$0xf]  ;;  %v1308_v36 = vld [vmem:[%s1931_s7 + $0x134] sm:$0xf0]  ;;  %v1399_v38 = vld [vmem:[%s1931_s7 + $0xf4] sm:$0xf] }
  0x24   :  { %377 = vmatmul.bf16.vlgmr.msra.gmra.mxu1 %v40_v45  ;;  %857 = vmatpush.bf16.msrb.mxu3 %v1299_v24  ;;  %v1311_v37 = vor.u32 %v1405_v35, %v1308_v36  ;;  %v1280_v39 = vld [vmem:[%s1931_s7 + $0x104] sm:$0xf0]  ;;  %v1286_v41 = vld [vmem:[%s1931_s7 + $0xf8] sm:$0xf]  ;;  %v1402_v42 = vld [vmem:[%s1931_s7 + $0x108] sm:$0xf0] }
  0x25   :  { %491 = vmatpush.bf16.msrb.mxu1 %v1360_v43  ;;  %v1283_v40 = vor.u32 %v1399_v38, %v1280_v39  ;;  %v1400_v43 = vld [vmem:[%s1931_s7 + $0xfc] sm:$0xf]  ;;  %v1238_v45 = vld [vmem:[%s1931_s7 + $0xa0] sm:$0xf]  ;;  %v1394_v50 = vld [vmem:[%s1931_s7 + $0xcc] sm:$0xf] }
  0x26   :  { %411 = vmatpush.bf16.msrb.mxu0 %v1352_v44  ;;  %v1259_v44 = vor.u32 %v1396_v32, %v1258_v26  ;;  %v1389_v59 = vld [vmem:[%s1931_s7 + $0xa4] sm:$0xf]  ;;  %v1200_v22 = vld [vmem:[%s1931_s7 + $0x64] sm:$0xf0]  ;;  %v1206_v23 = vld [vmem:[%s1931_s7 + $0x58] sm:$0xf] }
  0x27   :  { %575 = vmatpush.bf16.msrb.mxu2 %v1367_v60  ;;  %v1382_v24 = vld [vmem:[%s1931_s7 + $0x68] sm:$0xf0]  ;;  %v1376_v25 = vld [vmem:[%s1931_s7 + $0x38] sm:$0xf0]  ;;  %v1208_v27 = vld [vmem:[%s1931_s7 + $0x6c] sm:$0xf0] }
  0x28   :  { %858 = vmatpush.bf16.msrb.mxu3 %v1279_v28  ;;  %v1380_v26 = vld [vmem:[%s1931_s7 + $0x5c] sm:$0xf]  ;;  %v1411_v28 = vld [vmem:[%s1928_s4] ss:$0 sm:$0xff]  ;;  %v1207_v30 = vor.u32 %v1382_v24, %v1206_v23  ;;  %v1371_v35 = vld [vmem:[%s1931_s7 + $0x10] sm:$0xf0] }
  0x29   :  { %492 = vmatpush.bf16.msrb.mxu1 %v1359_v52  ;;  %v1266_v52 = vld [vmem:[%s1931_s7 + $0xd0] sm:$0xf]  ;;  %v1211_v32 = vor.u32 %v1380_v26, %v1208_v27  ;;  %v1408_v38 = vld [vmem:[%s1931_s7 + $0x138] sm:$0xf0] }
  0x2a   :  { %412 = vmatpush.bf16.msrb.mxu0 %v1351_v46  ;;  %v1391_v46 = vld [vmem:[%s1931_s7 + $0xb0] sm:$0xf0] }
  0x2b   :  { %576 = vmatpush.bf16.msrb.mxu2 %v1366_v63  ;;  %v1239_v60 = vor.u32 %v1391_v46, %v1238_v45  ;;  %v1246_v63 = vld [vmem:[%s1931_s7 + $0xa8] sm:$0xf] }
  0x2c   :  { %859 = vmatpush.bf16.msrb.mxu3 %v1259_v44  ;;  %v1403_v44 = vld [vmem:[%s1931_s7 + $0x110] sm:$0xf0] }
  0x2d   :  { %493 = vmatpush.bf16.msrb.mxu1 %v1358_v53  ;;  %v1397_v53 = vld [vmem:[%s1931_s7 + $0xe0] sm:$0xf0] }
  0x2e   :  { %413 = vmatpush.bf16.msrb.mxu0 %v1350_v47  ;;  %v1287_v47 = vor.u32 %v1402_v42, %v1286_v41 }
  0x2f   :  { %577 = vmatpush.bf16.msrb.mxu2 %v1365_v3  ;;  %v1248_v3 = vld [vmem:[%s1931_s7 + $0xbc] sm:$0xf0] }
  0x30   :  { %860 = vmatpush.bf16.msrb.mxu3 %v1239_v60  ;;  %v1160_v60 = vld [vmem:[%s1931_s7 + $0x14] sm:$0xf0] }
  0x31   :  { %494 = vmatpush.bf16.msrb.mxu1 %v1357_v54  ;;  %v1395_v54 = vld [vmem:[%s1931_s7 + $0xd4] sm:$0xf] }
  0x32   :  { %414 = vmatpush.bf16.msrb.mxu0 %v1349_v48  ;;  %v1288_v48 = vld [vmem:[%s1931_s7 + $0x10c] sm:$0xf0] }
  0x33   :  { %578 = vmatpush.bf16.msrb.mxu2 %v1364_v7  ;;  %v1384_v7 = vld [vmem:[%s1931_s7 + $0x7c] sm:$0xf] }
  0x35   :  { %495 = vmatpush.bf16.msrb.mxu1 %v1356_v55  ;;  %v1268_v55 = vld [vmem:[%s1931_s7 + $0xe4] sm:$0xf0] }
  0x36   :  { %415 = vmatpush.bf16.msrb.mxu0 %v1348_v49  ;;  %v1291_v49 = vor.u32 %v1400_v43, %v1288_v48  ;;  %v1294_v43 = vld [vmem:[%s1931_s7 + $0x100] sm:$0xf] }
  0x37   :  { %579 = vmatpush.bf16.msrb.mxu2 %v1363_v11  ;;  %v1226_v11 = vld [vmem:[%s1931_s7 + $0x80] sm:$0xf]  ;;  %v1295_v46 = vor.u32 %v1403_v44, %v1294_v43 }
  0x38   :  { %v1180_v48 = vld [vmem:[%s1931_s7 + $0x3c] sm:$0xf0] }
  0x39   :  { %1091 = vmatmul.msk.bf16.vlgmr.msrb.gmra.mxu0 %vm348_vm1, %v43_v51  ;;  %496 = vmatpush.bf16.msrb.mxu1 %v1355_v56  ;;  %v1260_v51 = vld [vmem:[%s1931_s7 + $0xdc] sm:$0xf0]  ;;  %v1218_v56 = vld [vmem:[%s1931_s7 + $0x78] sm:$0xf] }
  0x3a   :  { %870 = vmatpush.bf16.msra.mxu0 %v1303_v33 }
  0x3b   :  { %580 = vmatpush.bf16.msrb.mxu2 %v1362_v19  ;;  %v1379_v19 = vld [vmem:[%s1931_s7 + $0x54] sm:$0xf] }
  0x3c   :  { %v1203_v29 = vor.u32 %v1379_v19, %v1200_v22  ;;  %v1412_v19 = vld [vmem:[%s1930_s6] ss:$0 sm:$0xff]  ;;  %s1439_s6 = smov [#allocation2]  }
  0x3d   :  { %497 = vmatpush.bf16.msrb.mxu1 %v1354_v57  ;;  %v1263_v57 = vor.u32 %v1394_v50, %v1260_v51  ;;  %v1377_v51 = vld [vmem:[%s1931_s7 + $0x40] sm:$0xf0] }
  0x3e   :  { %871 = vmatpush.bf16.msra.mxu0 %v1283_v40 }
  0x3f   :  { %581 = vmatpush.bf16.msrb.mxu2 %v1361_v20 }
  0x41   :  { %498 = vmatpush.bf16.msrb.mxu1 %v1353_v58  ;;  %v1267_v58 = vor.u32 %v1397_v53, %v1266_v52  ;;  %v1375_v52 = vld [vmem:[%s1931_s7 + $0x34] sm:$0xf]  ;;  %v1188_v53 = vld [vmem:[%s1931_s7 + $0x44] sm:$0xf0] }
  0x42   :  { %872 = vmatpush.bf16.msra.mxu0 %v1263_v57  ;;  %v1398_v57 = vld [vmem:[%s1931_s7 + $0xe8] sm:$0xf0] }
  0x43   :  { %896 = vmatpush.bf16.msra.mxu2 %v1311_v37  ;;  %v1314_v37 = vld [vmem:[%s1931_s7 + $0x128] sm:$0xf] }
  0x44   :  { %v1315_v41 = vor.u32 %v1408_v38, %v1314_v37 }
  0x45   :  { %883 = vmatpush.bf16.msra.mxu1 %v1307_v34  ;;  %v1158_v34 = vld [vmem:[%s1931_s7] sm:$0xf] }
  0x46   :  { %v1159_v40 = vor.u32 %v1371_v35, %v1158_v34 }
  0x47   :  { %897 = vmatpush.bf16.msra.mxu2 %v1291_v49  ;;  %v1186_v49 = vld [vmem:[%s1931_s7 + $0x30] sm:$0xf] }
  0x49   :  { %884 = vmatpush.bf16.msra.mxu1 %v1287_v47  ;;  %v1374_v47 = vld [vmem:[%s1931_s7 + $0x2c] sm:$0xf] }
  0x4a   :  { %v1183_v50 = vor.u32 %v1374_v47, %v1180_v48 }
  0x4d   :  { %885 = vmatpush.bf16.msra.mxu1 %v1267_v58 }
  0x9e   :  { %v365_v61 = vpop.f32.mrf.mxu0 }
  0x9f   :  { %v366_v4 = vadd.f32 %v1410_v0, %v365_v61  ;;  %v1271_v61 = vor.u32 %v1395_v54, %v1268_v55  ;;  %v1392_v0 = vld [vmem:[%s1931_s7 + $0xb8] sm:$0xf0]  ;;  %v1187_v54 = vor.u32 %v1377_v51, %v1186_v49  ;;  %v1191_v55 = vor.u32 %v1375_v52, %v1188_v53 }
  0xa1   :  { %v378_v62 = vpop.f32.mrf.mxu1  ;;  %898 = vmatpush.bf16.msra.mxu2 %v1271_v61  ;;  %v1166_v61 = vld [vmem:[%s1931_s7 + $0x8] sm:$0xf] }
  0xa2   :  { %v379_v8 = vadd.f32 %v378_v62, %v366_v4  ;;  %v1240_v62 = vld [vmem:[%s1931_s7 + $0xb4] sm:$0xf0]  ;;  %v1198_v4 = vld [vmem:[%s1931_s7 + $0x50] sm:$0xf] }
  0xa5   :  { %v391_v1 = vpop.f32.mrf.mxu2 }
  0xa6   :  { %v404_v2 = vpop.f32.mrf.mxu3  ;;  %v367_v5 = vpop.f32.mrf.mxu0  ;;  %v392_v12 = vadd.f32 %v391_v1, %v379_v8  ;;  %v1386_v1 = vld [vmem:[%s1931_s7 + $0x88] sm:$0xf0] }
  0xa7   :  { %v1243_v5 = vor.u32 %v1389_v59, %v1240_v62  ;;  %v1219_v8 = vor.u32 %v1386_v1, %v1218_v56  ;;  %v1274_v56 = vld [vmem:[%s1931_s7 + $0xd8] sm:$0xf]  ;;  %v1369_v59 = vld [vmem:[%s1931_s7 + $0x4] sm:$0xf]  ;;  %v1168_v1 = vld [vmem:[%s1931_s7 + $0x1c] sm:$0xf0] }
  0xa8   :  { %v405_v13 = vadd.f32 %v404_v2, %v392_v12  ;;  %v1390_v2 = vld [vmem:[%s1931_s7 + $0xac] sm:$0xf]  ;;  %v1387_v12 = vld [vmem:[%s1931_s7 + $0x90] sm:$0xf0]  ;;  %v1275_v58 = vor.u32 %v1398_v57, %v1274_v56  ;;  %v1163_v62 = vor.u32 %v1369_v59, %v1160_v60 }
  0xa9   :  { %v380_v6 = vpop.f32.mrf.mxu1  ;;  %873 = vmatpush.bf16.msra.mxu0 %v1243_v5  ;;  %861 = vmatpush.bf16.msrb.mxu3 %v1219_v8  ;;  %v1393_v5 = vld [vmem:[%s1931_s7 + $0xc0] sm:$0xf0]  ;;  %v1388_v8 = vld [vmem:[%s1931_s7 + $0x98] sm:$0xf0] }
  0xaa   :  { %v1247_v6 = vor.u32 %v1392_v0, %v1246_v63  ;;  %v1372_v63 = vld [vmem:[%s1931_s7 + $0x18] sm:$0xf0]  ;;  %v1370_v0 = vld [vmem:[%s1931_s7 + $0xc] sm:$0xf] }
  0xac   :  { %886 = vmatpush.bf16.msra.mxu1 %v1247_v6 }
  0xad   :  { %v393_v9 = vpop.f32.mrf.mxu2 }
  0xae   :  { %v406_v10 = vpop.f32.mrf.mxu3  ;;  %v1251_v9 = vor.u32 %v1390_v2, %v1248_v3  ;;  %v1167_v2 = vor.u32 %v1372_v63, %v1166_v61  ;;  %v1171_v3 = vor.u32 %v1370_v0, %v1168_v1 }
  0xaf   :  { %v1220_v10 = vld [vmem:[%s1931_s7 + $0x8c] sm:$0xf0] }
  0xb0   :  { %899 = vmatpush.bf16.msra.mxu2 %v1251_v9 }
  0xb6   :  { %v417_v14 = vpop.f32.mrf.mxu0 }
  0xb7   :  { %v418_v15 = vadd.f32 %v417_v14, %v405_v13  ;;  %v1381_v13 = vld [vmem:[%s1931_s7 + $0x60] sm:$0xf0] }
  0xb8   :  { %v1385_v14 = vld [vmem:[%s1931_s7 + $0x84] sm:$0xf]  ;;  %v1199_v20 = vor.u32 %v1381_v13, %v1198_v4  ;;  %v1254_v4 = vld [vmem:[%s1931_s7 + $0xb0] sm:$0xf]  ;;  %v1194_v13 = vld [vmem:[%s1931_s7 + $0x38] sm:$0xf] }
  0xb9   :  { %v421_v16 = vmax.f32 %v418_v15, 0.0  ;;  %v1228_v15 = vld [vmem:[%s1931_s7 + $0x94] sm:$0xf0]  ;;  %v1255_v6 = vor.u32 %v1393_v5, %v1254_v4 }
  0xba   :  { %v1231_v21 = vor.u32 %v1385_v14, %v1228_v15  ;;  %862 = vmatpush.bf16.msrb.mxu3 %v1199_v20  ;;  %v1378_v14 = vld [vmem:[%s1931_s7 + $0x48] sm:$0xf0] }
  0xbb   :  { %v422_v17 = vpack.c.bf16 %v421_v16, %v421_v16  ;;  %v1178_v16 = vld [vmem:[%s1931_s7 + $0x28] sm:$0xf]  ;;  %v1195_v15 = vor.u32 %v1378_v14, %v1194_v13 }
  0xbc   :  { %v1179_v31 = vor.u32 %v1376_v25, %v1178_v16  ;;  %900 = vmatpush.bf16.msra.mxu2 %v1231_v21  ;;  %v1174_v16 = vld [vmem:[%s1931_s7 + $0x10] sm:$0xf]  ;;  %v637_v25 = vld [vmem:[%s1932_s8] sm:$0x1f] }
  0xbd   :  { %499 = vmatmul.bf16.vlgmr.msrb.gmra.mxu1 %v422_v17  ;;  %v1223_v17 = vor.u32 %v1384_v7, %v1220_v10  ;;  %v1234_v7 = vld [vmem:[%s1931_s7 + $0x88] sm:$0xf]  ;;  %v1214_v10 = vld [vmem:[%s1931_s7 + $0x60] sm:$0xf]  ;;  %v640_v26 = vperm.slane %v637_v25, 1  ;;  %v641_v27 = vperm.slane %v637_v25, 2 }
  0xbe   :  { %v419_v18 = vpop.f32.mrf.mxu0  ;;  %863 = vmatpush.bf16.msrb.mxu3 %v1179_v31  ;;  %v1235_v9 = vor.u32 %v1388_v8, %v1234_v7 }
  0xbf   :  { %v1227_v18 = vor.u32 %v1387_v12, %v1226_v11  ;;  %874 = vmatpush.bf16.msra.mxu0 %v1223_v17  ;;  %v1383_v11 = vld [vmem:[%s1931_s7 + $0x70] sm:$0xf0]  ;;  %v1373_v17 = vld [vmem:[%s1931_s7 + $0x20] sm:$0xf0]  ;;  %s932_s7 = sshll.u32 %s1439_s6, 4  ;;  %s933_s7 = int_to_ptr.vmem [resolvable:$true] %s932_s7 }
  0xc0   :  { %901 = vmatpush.bf16.msra.mxu2 %v1211_v32  ;;  %v1215_v12 = vor.u32 %v1383_v11, %v1214_v10  ;;  %v639_v32 = vperm.slane %v637_v25, 0 }
  0xc1   :  { %887 = vmatpush.bf16.msra.mxu1 %v1227_v18  ;;  %v1175_v18 = vor.u32 %v1373_v17, %v1174_v16 }
  0xc2   :  { %864 = vmatpush.bf16.msrb.mxu3 %v1159_v40 }
  0xc3   :  { %875 = vmatpush.bf16.msra.mxu0 %v1203_v29 }
  0xc4   :  { %902 = vmatpush.bf16.msra.mxu2 %v1191_v55 }
  0xc5   :  { %888 = vmatpush.bf16.msra.mxu1 %v1207_v30 }
  0xc6   :  { %909 = vmatpush.bf16.msra.mxu3 %v1315_v41 }
  0xc7   :  { %876 = vmatpush.bf16.msra.mxu0 %v1183_v50 }
  0xc8   :  { %903 = vmatpush.bf16.msra.mxu2 %v1171_v3 }
  0xc9   :  { %889 = vmatpush.bf16.msra.mxu1 %v1187_v54 }
  0xca   :  { %910 = vmatpush.bf16.msra.mxu3 %v1295_v46 }
  0xcb   :  { %877 = vmatpush.bf16.msra.mxu0 %v1163_v62 }
  0xcd   :  { %890 = vmatpush.bf16.msra.mxu1 %v1167_v2 }
  0xce   :  { %911 = vmatpush.bf16.msra.mxu3 %v1275_v58 }
  0xd2   :  { %912 = vmatpush.bf16.msra.mxu3 %v1255_v6 }
  0xd6   :  { %913 = vmatpush.bf16.msra.mxu3 %v1235_v9 }
  0xda   :  { %914 = vmatpush.bf16.msra.mxu3 %v1215_v12 }
  0xde   :  { %915 = vmatpush.bf16.msra.mxu3 %v1195_v15 }
  0xe2   :  { %916 = vmatpush.bf16.msra.mxu3 %v1175_v18 }
 0x13a   :  { %v500_v33 = vpop.f32.mrf.mxu1 }
 0x13b   :  { %v501_v36 = vadd.f32 %v1411_v28, %v500_v33  ;;  %v642_v33 = vperm.slane %v637_v25, 3 }
 0x13d   :  { %v504_v39 = vmax.f32 %v501_v36, 0.0 }
 0x13f   :  { %v505_v42 = vpack.c.bf16 %v504_v39, %v504_v39 }
 0x141   :  { %582 = vmatmul.bf16.vlgmr.msrb.gmra.mxu2 %v505_v42  ;;  %v643_v42 = vperm.slane %v637_v25, 4 }
 0x142   :  { %v502_v45 = vpop.f32.mrf.mxu1 }
 0x1c4   :  { %v583_v20 = vpop.f32.mrf.mxu2 }
 0x1c5   :  { %v584_v21 = vadd.f32 %v1412_v19, %v583_v20 }
 0x1c7   :  { %v587_v22 = vmax.f32 %v584_v21, 0.0 }
 0x1c9   :  { %v588_v23 = vpack.c.bf16 %v587_v22, %v587_v22 }
 0x1cb   :  { %865 = vmatmul.bf16.vlgmr.msrb.gmra.mxu3 %v588_v23  ;;  %878 = vmatmul.bf16.vlgmr.msra.gmra.mxu0 %v588_v23 }
 0x1cc   :  { %891 = vmatmul.bf16.vlgmr.msra.gmra.mxu1 %v588_v23  ;;  %904 = vmatmul.bf16.vlgmr.msra.gmra.mxu2 %v588_v23  ;;  %v585_v24 = vpop.f32.mrf.mxu2 }
 0x1db   :  { %917 = vmatmul.bf16.vlgmr.msra.gmra.mxu3 %v588_v23 }
 0x248   :  { %v879_v28 = vpop.f32.mrf.mxu0 }
 0x249   :  { %v880_v29 = vadd.f32 %v879_v28, %v640_v26  ;;  %v892_v30 = vpop.f32.mrf.mxu1 }
 0x24a   :  { %v893_v31 = vadd.f32 %v892_v30, %v641_v27 }
 0x24b   :  { %923 = vst [vmem:[#allocation2 + $0x8] sm:$0xff] %v880_v29 }
 0x24c   :  { %924 = vst [vmem:[#allocation2 + $0x10] sm:$0xff] %v893_v31 }
 0x24e   :  { %v866_v34 = vpop.f32.mrf.mxu3 }
 0x24f   :  { %v867_v35 = vadd.f32 %v866_v34, %v639_v32  ;;  %v905_v36 = vpop.f32.mrf.mxu2 }
 0x250   :  { %v906_v37 = vadd.f32 %v905_v36, %v642_v33  ;;  %v881_v38 = vpop.f32.mrf.mxu0 }
 0x251   :  { %922 = vst [vmem:[#allocation2] sm:$0xff] %v867_v35  ;;  %v894_v39 = vpop.f32.mrf.mxu1 }
 0x252   :  { %925 = vst [vmem:[#allocation2 + $0x18] sm:$0xff] %v906_v37 }
 0x256   :  { %v868_v40 = vpop.f32.mrf.mxu3 }
 0x257   :  { %v907_v41 = vpop.f32.mrf.mxu2 }
 0x25e   :  { %v918_v43 = vpop.f32.mrf.mxu3 }
 0x25f   :  { %v919_v44 = vadd.f32 %v918_v43, %v643_v42 }
 0x261   :  { %926 = vst.msk [vmem:[#allocation2 + $0x20] sm:$0xff] %vm348_vm1, %v919_v44 }
 0x262   :  { %937 = dma.vmem_to_hbm [thread:$0]  %s933_s7, 640, %s935_s26, [#allocation3]  }
 0x266   :  { %v920_v45 = vpop.f32.mrf.mxu3 }
 0x267   :  { %1437 = dma.done.wait [#allocation3], 640  }
 0x268   :  { %1438 = vsyncadd [#allocation3], 4294966656 }
 0x269   :  { %942 = vsyncpa [#allocation3], 1 }

</bundles_post_ra>
